<compile_context>
chip_gen: v6e
topology: v6e:2x2x1
jax: 0.10.0
libtpu: 0.0.40
codegen_flags: <defaults>
</compile_context>

<pallas_src>
import jax
import jax.numpy as jnp
from jax.experimental import pallas as pl
from jax.experimental.pallas import tpu as pltpu

H = 32          # hidden size
D = 32          # input size
T = 8           # sequence length
LANES = 128
G_R = 0         # lane group [0:32): reset gate, candidate, hidden state
G_Z = 2 * H     # lane group [64:96): update gate (64 lanes from G_R -> symmetric roll)


def _rnn_kernel(data_ref, params_ref, out_ref):
    """Runs the full T-step recurrence in one kernel invocation.

    data_ref:   (T+1, 128) f32. Rows 0..T-1: [x_t | 1 | 0...]; row T: [h0 | 0...].
    params_ref: (4, 128, 128) bf16 packed weights:
                  [0] W1 : h     -> reset logits @ lanes[0:32), update logits @ lanes[64:96)
                  [1] W2 : (h*r) -> candidate h-contribution @ lanes[0:32)
                  [2] Wxg: x_aug -> gate x-contributions (+ biases via the 1-column)
                  [3] Wxc: x_aug -> candidate x-contribution (+ bias)
    out_ref:    (1, 128) f32; final hidden state in lanes [0:32), zeros elsewhere.
    """
    bf16 = jnp.bfloat16
    w1, w2, wxg, wxc = params_ref[0], params_ref[1], params_ref[2], params_ref[3]

    x_aug = data_ref[0:T, :].astype(bf16)          # (T, 128), sublane-aligned slice
    hh = data_ref[T:T + 1, :]                      # (1, 128) f32, h at lanes [0:32)

    # Hoisted: all per-step x contributions (+ folded biases) with two pre-loop dots.
    xwg = jnp.dot(x_aug, wxg, preferred_element_type=jnp.float32)   # (T, 128)
    xwc = jnp.dot(x_aug, wxc, preferred_element_type=jnp.float32)   # (T, 128)

    for t in range(T):                              # fully unrolled, static indices
        pre = jnp.dot(hh.astype(bf16), w1,
                      preferred_element_type=jnp.float32) + xwg[t:t + 1, :]
        rz = jnp.maximum(pre, 0.0)                  # full-width relu: r@[0:32), z@[64:96)
        hr = hh * rz                                # h * r at lanes [0:32)
        cl = jnp.dot(hr.astype(bf16), w2,
                     preferred_element_type=jnp.float32) + xwc[t:t + 1, :]
        cand = jnp.tanh(cl)                         # candidate at lanes [0:32), 0 elsewhere
        z0 = pltpu.roll(rz, 2 * H, axis=1)          # z -> lanes [0:32) (direction-symmetric)
        hh = hh + z0 * (cand - hh)                  # (1-z)*h + z*cand; lanes >=32 stay 0
    out_ref[...] = hh                               # single lane-dense store


def pack_rnn_params(w_reset, b_reset, w_update, b_update, w, b):
    """Pack all weights/biases into one (4,128,128) bf16 array.

    Call ONCE at parameter-load time (hoisted out of the per-call hot path).
    Torch convention: w_* are (H, H+D) acting on cat(h, x); biases are (H,).
    """
    f32 = jnp.float32
    w_reset, w_update, w = (a.astype(f32) for a in (w_reset, w_update, w))
    b_reset, b_update, b = (a.astype(f32) for a in (b_reset, b_update, b))

    # W1: hidden-state rows of the fused gate weight (only rows [0:H) are nonzero).
    w1 = jnp.zeros((LANES, LANES), f32)
    w1 = w1.at[0:H, G_R:G_R + H].set(w_reset[:, :H].T)
    w1 = w1.at[0:H, G_Z:G_Z + H].set(w_update[:, :H].T)

    # W2: candidate hidden-state weight applied to (h * r), output at lanes [0:32).
    w2 = jnp.zeros((LANES, LANES), f32).at[0:H, G_R:G_R + H].set(w[:, :H].T)

    # Wxg / Wxc: x-contributions; row D (hit by the constant-1 column) carries biases.
    wxg = jnp.zeros((LANES, LANES), f32)
    wxg = wxg.at[0:D, G_R:G_R + H].set(w_reset[:, H:].T)
    wxg = wxg.at[0:D, G_Z:G_Z + H].set(w_update[:, H:].T)
    wxg = wxg.at[D, G_R:G_R + H].set(b_reset)
    wxg = wxg.at[D, G_Z:G_Z + H].set(b_update)

    wxc = jnp.zeros((LANES, LANES), f32)
    wxc = wxc.at[0:D, G_R:G_R + H].set(w[:, H:].T)
    wxc = wxc.at[D, G_R:G_R + H].set(b)

    return jnp.stack([w1, w2, wxg, wxc]).astype(jnp.bfloat16)


@jax.jit
def rnn_forward(h0, xs, packed_params):
    """h0: (H,), xs: (T, D), packed_params from pack_rnn_params.

    Returns the final hidden state (H,).
    (The original PyTorch forward returns None; we return h for verification.)
    """
    f32 = jnp.float32
    x_aug = jnp.zeros((T, LANES), f32)
    x_aug = x_aug.at[:, :D].set(xs.astype(f32))
    x_aug = x_aug.at[:, D].set(1.0)                  # constant-1 column folds biases in
    h_row = jnp.zeros((1, LANES), f32).at[0, :H].set(h0.astype(f32))
    data = jnp.concatenate([x_aug, h_row], axis=0)   # (T+1, 128)

    full = lambda shape: pl.BlockSpec(shape, lambda i: (0,) * len(shape))
    out = pl.pallas_call(
        _rnn_kernel,
        out_shape=jax.ShapeDtypeStruct((1, LANES), f32),
        grid_spec=pltpu.PrefetchScalarGridSpec(
            num_scalar_prefetch=0,
            grid=(1,),                               # single invocation; time loop in-kernel
            in_specs=[
                full((T + 1, LANES)),                # data  (one DMA)
                full((4, LANES, LANES)),             # packed params (one DMA)
            ],
            out_specs=full((1, LANES)),
        ),
        compiler_params=pltpu.CompilerParams(dimension_semantics=("arbitrary",)),
    )(data, packed_params)
    return out[0, :H]


def _reference(h0, xs, w_reset, b_reset, w_update, b_update, w, b):
    h = h0.astype(jnp.float32)
    for t in range(xs.shape[0]):
        x = xs[t].astype(jnp.float32)
        hx = jnp.concatenate([h, x])
        r = jax.nn.relu(w_reset @ hx + b_reset)
        z = jax.nn.relu(w_update @ hx + b_update)
        h_cand = jnp.tanh(w @ jnp.concatenate([h * r, x]) + b)
        h = (1.0 - z) * h + z * h_cand
    return h


if __name__ == "__main__":
    key = jax.random.PRNGKey(0)
    ks = jax.random.split(key, 8)
    scale = 0.1
    h0 = jax.random.normal(ks[0], (H,), jnp.float32)
    xs = jax.random.normal(ks[1], (T, D), jnp.float32)
    w_reset = scale * jax.random.normal(ks[2], (H, H + D), jnp.float32)
    b_reset = scale * jax.random.normal(ks[3], (H,), jnp.float32)
    w_update = scale * jax.random.normal(ks[4], (H, H + D), jnp.float32)
    b_update = scale * jax.random.normal(ks[5], (H,), jnp.float32)
    w = scale * jax.random.normal(ks[6], (H, H + D), jnp.float32)
    b = scale * jax.random.normal(ks[7], (H,), jnp.float32)

    # One-time parameter packing (hoisted out of the per-call hot path).
    packed = pack_rnn_params(w_reset, b_reset, w_update, b_update, w, b)

    out = jax.block_until_ready(rnn_forward(h0, xs, packed))

    ref = _reference(h0, xs, w_reset, b_reset, w_update, b_update, w, b)
    # bf16 MXU operands (f32 accumulate) -> loosened tolerance vs the f32 reference.
    assert jnp.allclose(out, ref, atol=5e-2, rtol=5e-2), (out, ref)

    # TODO(synk): the original forward returns None; we return the final hidden state instead.
    print("KERNEL_OK")
</pallas_src>

<mosaic_0001>
module attributes {stable_mosaic.version = 11 : i64} {
  func.func @_rnn_kernel(%arg0: i32, %arg1: memref<9x128xf32, #tpu.memory_space<vmem>>, %arg2: memref<4x128x128xbf16, #tpu.memory_space<vmem>>, %arg3: memref<1x128xf32, #tpu.memory_space<vmem>>) attributes {dimension_semantics = [#tpu.dimension_semantics<arbitrary>], iteration_bounds = array<i64: 1>, scalar_prefetch = 0 : i64, scratch_operands = 0 : i64, tpu.core_type = #tpu.core_type<tc>, window_params = [{pipeline_mode = #tpu.pipeline_mode<synchronous>, transform_indices = @transform_0, window_bounds = array<i64: 9, 128>}, {pipeline_mode = #tpu.pipeline_mode<synchronous>, transform_indices = @transform_1, window_bounds = array<i64: 4, 128, 128>}, {pipeline_mode = #tpu.pipeline_mode<synchronous>, transform_indices = @transform_2, window_bounds = array<i64: 1, 128>}]} {
    %c0 = arith.constant 0 : index
    %c0_0 = arith.constant 0 : index
    %c0_1 = arith.constant 0 : index
    %0 = vector.load %arg2[%c0, %c0_0, %c0_1] : memref<4x128x128xbf16, #tpu.memory_space<vmem>>, vector<1x128x128xbf16>
    %1 = vector.shape_cast %0 : vector<1x128x128xbf16> to vector<128x128xbf16>
    %c1 = arith.constant 1 : index
    %c0_2 = arith.constant 0 : index
    %c0_3 = arith.constant 0 : index
    %2 = vector.load %arg2[%c1, %c0_2, %c0_3] : memref<4x128x128xbf16, #tpu.memory_space<vmem>>, vector<1x128x128xbf16>
    %3 = vector.shape_cast %2 : vector<1x128x128xbf16> to vector<128x128xbf16>
    %c2 = arith.constant 2 : index
    %c0_4 = arith.constant 0 : index
    %c0_5 = arith.constant 0 : index
    %4 = vector.load %arg2[%c2, %c0_4, %c0_5] : memref<4x128x128xbf16, #tpu.memory_space<vmem>>, vector<1x128x128xbf16>
    %5 = vector.shape_cast %4 : vector<1x128x128xbf16> to vector<128x128xbf16>
    %c3 = arith.constant 3 : index
    %c0_6 = arith.constant 0 : index
    %c0_7 = arith.constant 0 : index
    %6 = vector.load %arg2[%c3, %c0_6, %c0_7] : memref<4x128x128xbf16, #tpu.memory_space<vmem>>, vector<1x128x128xbf16>
    %7 = vector.shape_cast %6 : vector<1x128x128xbf16> to vector<128x128xbf16>
    %c0_8 = arith.constant 0 : index
    %c0_9 = arith.constant 0 : index
    %8 = vector.load %arg1[%c0_8, %c0_9] : memref<9x128xf32, #tpu.memory_space<vmem>>, vector<8x128xf32>
    %9 = arith.truncf %8 : vector<8x128xf32> to vector<8x128xbf16>
    %c8 = arith.constant 8 : index
    %c0_10 = arith.constant 0 : index
    %10 = vector.load %arg1[%c8, %c0_10] : memref<9x128xf32, #tpu.memory_space<vmem>>, vector<1x128xf32>
    %cst = arith.constant dense<0.000000e+00> : vector<8x128xf32>
    %11 = tpu.matmul %9, %5, %cst {dimension_numbers = #tpu.dot_dimension_numbers<[1], [0], [0], [1], [0, 0, 1, 1], [], []>} : vector<8x128xbf16>, vector<128x128xbf16>, vector<8x128xf32> -> vector<8x128xf32>
    %cst_11 = arith.constant dense<0.000000e+00> : vector<8x128xf32>
    %12 = tpu.matmul %9, %7, %cst_11 {dimension_numbers = #tpu.dot_dimension_numbers<[1], [0], [0], [1], [0, 0, 1, 1], [], []>} : vector<8x128xbf16>, vector<128x128xbf16>, vector<8x128xf32> -> vector<8x128xf32>
    %13 = arith.truncf %10 : vector<1x128xf32> to vector<1x128xbf16>
    %cst_12 = arith.constant dense<0.000000e+00> : vector<1x128xf32>
    %14 = tpu.matmul %13, %1, %cst_12 {dimension_numbers = #tpu.dot_dimension_numbers<[1], [0], [0], [1], [0, 0, 1, 1], [], []>} : vector<1x128xbf16>, vector<128x128xbf16>, vector<1x128xf32> -> vector<1x128xf32>
    %15 = vector.extract_strided_slice %11 {offsets = [0, 0], sizes = [1, 128], strides = [1, 1]} : vector<8x128xf32> to vector<1x128xf32>
    %16 = arith.addf %14, %15 : vector<1x128xf32>
    %cst_13 = arith.constant 0.000000e+00 : f32
    %17 = vector.broadcast %cst_13 : f32 to vector<1x128xf32>
    %18 = arith.maximumf %16, %17 : vector<1x128xf32>
    %19 = arith.mulf %10, %18 : vector<1x128xf32>
    %20 = arith.truncf %19 : vector<1x128xf32> to vector<1x128xbf16>
    %cst_14 = arith.constant dense<0.000000e+00> : vector<1x128xf32>
    %21 = tpu.matmul %20, %3, %cst_14 {dimension_numbers = #tpu.dot_dimension_numbers<[1], [0], [0], [1], [0, 0, 1, 1], [], []>} : vector<1x128xbf16>, vector<128x128xbf16>, vector<1x128xf32> -> vector<1x128xf32>
    %22 = vector.extract_strided_slice %12 {offsets = [0, 0], sizes = [1, 128], strides = [1, 1]} : vector<8x128xf32> to vector<1x128xf32>
    %23 = arith.addf %21, %22 : vector<1x128xf32>
    %24 = math.tanh %23 : vector<1x128xf32>
    %c64_i32 = arith.constant 64 : i32
    %25 = tpu.dynamic_rotate %18 by %c64_i32 dim 1 : vector<1x128xf32>, i32 -> vector<1x128xf32>
    %26 = arith.subf %24, %10 : vector<1x128xf32>
    %27 = arith.mulf %25, %26 : vector<1x128xf32>
    %28 = arith.addf %10, %27 : vector<1x128xf32>
    %29 = arith.truncf %28 : vector<1x128xf32> to vector<1x128xbf16>
    %cst_15 = arith.constant dense<0.000000e+00> : vector<1x128xf32>
    %30 = tpu.matmul %29, %1, %cst_15 {dimension_numbers = #tpu.dot_dimension_numbers<[1], [0], [0], [1], [0, 0, 1, 1], [], []>} : vector<1x128xbf16>, vector<128x128xbf16>, vector<1x128xf32> -> vector<1x128xf32>
    %31 = vector.extract_strided_slice %11 {offsets = [1, 0], sizes = [1, 128], strides = [1, 1]} : vector<8x128xf32> to vector<1x128xf32>
    %32 = arith.addf %30, %31 : vector<1x128xf32>
    %cst_16 = arith.constant 0.000000e+00 : f32
    %33 = vector.broadcast %cst_16 : f32 to vector<1x128xf32>
    %34 = arith.maximumf %32, %33 : vector<1x128xf32>
    %35 = arith.mulf %28, %34 : vector<1x128xf32>
    %36 = arith.truncf %35 : vector<1x128xf32> to vector<1x128xbf16>
    %cst_17 = arith.constant dense<0.000000e+00> : vector<1x128xf32>
    %37 = tpu.matmul %36, %3, %cst_17 {dimension_numbers = #tpu.dot_dimension_numbers<[1], [0], [0], [1], [0, 0, 1, 1], [], []>} : vector<1x128xbf16>, vector<128x128xbf16>, vector<1x128xf32> -> vector<1x128xf32>
    %38 = vector.extract_strided_slice %12 {offsets = [1, 0], sizes = [1, 128], strides = [1, 1]} : vector<8x128xf32> to vector<1x128xf32>
    %39 = arith.addf %37, %38 : vector<1x128xf32>
    %40 = math.tanh %39 : vector<1x128xf32>
    %c64_i32_18 = arith.constant 64 : i32
    %41 = tpu.dynamic_rotate %34 by %c64_i32_18 dim 1 : vector<1x128xf32>, i32 -> vector<1x128xf32>
    %42 = arith.subf %40, %28 : vector<1x128xf32>
    %43 = arith.mulf %41, %42 : vector<1x128xf32>
    %44 = arith.addf %28, %43 : vector<1x128xf32>
    %45 = arith.truncf %44 : vector<1x128xf32> to vector<1x128xbf16>
    %cst_19 = arith.constant dense<0.000000e+00> : vector<1x128xf32>
    %46 = tpu.matmul %45, %1, %cst_19 {dimension_numbers = #tpu.dot_dimension_numbers<[1], [0], [0], [1], [0, 0, 1, 1], [], []>} : vector<1x128xbf16>, vector<128x128xbf16>, vector<1x128xf32> -> vector<1x128xf32>
    %47 = vector.extract_strided_slice %11 {offsets = [2, 0], sizes = [1, 128], strides = [1, 1]} : vector<8x128xf32> to vector<1x128xf32>
    %48 = arith.addf %46, %47 : vector<1x128xf32>
    %cst_20 = arith.constant 0.000000e+00 : f32
    %49 = vector.broadcast %cst_20 : f32 to vector<1x128xf32>
    %50 = arith.maximumf %48, %49 : vector<1x128xf32>
    %51 = arith.mulf %44, %50 : vector<1x128xf32>
    %52 = arith.truncf %51 : vector<1x128xf32> to vector<1x128xbf16>
    %cst_21 = arith.constant dense<0.000000e+00> : vector<1x128xf32>
    %53 = tpu.matmul %52, %3, %cst_21 {dimension_numbers = #tpu.dot_dimension_numbers<[1], [0], [0], [1], [0, 0, 1, 1], [], []>} : vector<1x128xbf16>, vector<128x128xbf16>, vector<1x128xf32> -> vector<1x128xf32>
    %54 = vector.extract_strided_slice %12 {offsets = [2, 0], sizes = [1, 128], strides = [1, 1]} : vector<8x128xf32> to vector<1x128xf32>
    %55 = arith.addf %53, %54 : vector<1x128xf32>
    %56 = math.tanh %55 : vector<1x128xf32>
    %c64_i32_22 = arith.constant 64 : i32
    %57 = tpu.dynamic_rotate %50 by %c64_i32_22 dim 1 : vector<1x128xf32>, i32 -> vector<1x128xf32>
    %58 = arith.subf %56, %44 : vector<1x128xf32>
    %59 = arith.mulf %57, %58 : vector<1x128xf32>
    %60 = arith.addf %44, %59 : vector<1x128xf32>
    %61 = arith.truncf %60 : vector<1x128xf32> to vector<1x128xbf16>
    %cst_23 = arith.constant dense<0.000000e+00> : vector<1x128xf32>
    %62 = tpu.matmul %61, %1, %cst_23 {dimension_numbers = #tpu.dot_dimension_numbers<[1], [0], [0], [1], [0, 0, 1, 1], [], []>} : vector<1x128xbf16>, vector<128x128xbf16>, vector<1x128xf32> -> vector<1x128xf32>
    %63 = vector.extract_strided_slice %11 {offsets = [3, 0], sizes = [1, 128], strides = [1, 1]} : vector<8x128xf32> to vector<1x128xf32>
    %64 = arith.addf %62, %63 : vector<1x128xf32>
    %cst_24 = arith.constant 0.000000e+00 : f32
    %65 = vector.broadcast %cst_24 : f32 to vector<1x128xf32>
    %66 = arith.maximumf %64, %65 : vector<1x128xf32>
    %67 = arith.mulf %60, %66 : vector<1x128xf32>
    %68 = arith.truncf %67 : vector<1x128xf32> to vector<1x128xbf16>
    %cst_25 = arith.constant dense<0.000000e+00> : vector<1x128xf32>
    %69 = tpu.matmul %68, %3, %cst_25 {dimension_numbers = #tpu.dot_dimension_numbers<[1], [0], [0], [1], [0, 0, 1, 1], [], []>} : vector<1x128xbf16>, vector<128x128xbf16>, vector<1x128xf32> -> vector<1x128xf32>
    %70 = vector.extract_strided_slice %12 {offsets = [3, 0], sizes = [1, 128], strides = [1, 1]} : vector<8x128xf32> to vector<1x128xf32>
    %71 = arith.addf %69, %70 : vector<1x128xf32>
    %72 = math.tanh %71 : vector<1x128xf32>
    %c64_i32_26 = arith.constant 64 : i32
    %73 = tpu.dynamic_rotate %66 by %c64_i32_26 dim 1 : vector<1x128xf32>, i32 -> vector<1x128xf32>
    %74 = arith.subf %72, %60 : vector<1x128xf32>
    %75 = arith.mulf %73, %74 : vector<1x128xf32>
    %76 = arith.addf %60, %75 : vector<1x128xf32>
    %77 = arith.truncf %76 : vector<1x128xf32> to vector<1x128xbf16>
    %cst_27 = arith.constant dense<0.000000e+00> : vector<1x128xf32>
    %78 = tpu.matmul %77, %1, %cst_27 {dimension_numbers = #tpu.dot_dimension_numbers<[1], [0], [0], [1], [0, 0, 1, 1], [], []>} : vector<1x128xbf16>, vector<128x128xbf16>, vector<1x128xf32> -> vector<1x128xf32>
    %79 = vector.extract_strided_slice %11 {offsets = [4, 0], sizes = [1, 128], strides = [1, 1]} : vector<8x128xf32> to vector<1x128xf32>
    %80 = arith.addf %78, %79 : vector<1x128xf32>
    %cst_28 = arith.constant 0.000000e+00 : f32
    %81 = vector.broadcast %cst_28 : f32 to vector<1x128xf32>
    %82 = arith.maximumf %80, %81 : vector<1x128xf32>
    %83 = arith.mulf %76, %82 : vector<1x128xf32>
    %84 = arith.truncf %83 : vector<1x128xf32> to vector<1x128xbf16>
    %cst_29 = arith.constant dense<0.000000e+00> : vector<1x128xf32>
    %85 = tpu.matmul %84, %3, %cst_29 {dimension_numbers = #tpu.dot_dimension_numbers<[1], [0], [0], [1], [0, 0, 1, 1], [], []>} : vector<1x128xbf16>, vector<128x128xbf16>, vector<1x128xf32> -> vector<1x128xf32>
    %86 = vector.extract_strided_slice %12 {offsets = [4, 0], sizes = [1, 128], strides = [1, 1]} : vector<8x128xf32> to vector<1x128xf32>
    %87 = arith.addf %85, %86 : vector<1x128xf32>
    %88 = math.tanh %87 : vector<1x128xf32>
    %c64_i32_30 = arith.constant 64 : i32
    %89 = tpu.dynamic_rotate %82 by %c64_i32_30 dim 1 : vector<1x128xf32>, i32 -> vector<1x128xf32>
    %90 = arith.subf %88, %76 : vector<1x128xf32>
    %91 = arith.mulf %89, %90 : vector<1x128xf32>
    %92 = arith.addf %76, %91 : vector<1x128xf32>
    %93 = arith.truncf %92 : vector<1x128xf32> to vector<1x128xbf16>
    %cst_31 = arith.constant dense<0.000000e+00> : vector<1x128xf32>
    %94 = tpu.matmul %93, %1, %cst_31 {dimension_numbers = #tpu.dot_dimension_numbers<[1], [0], [0], [1], [0, 0, 1, 1], [], []>} : vector<1x128xbf16>, vector<128x128xbf16>, vector<1x128xf32> -> vector<1x128xf32>
    %95 = vector.extract_strided_slice %11 {offsets = [5, 0], sizes = [1, 128], strides = [1, 1]} : vector<8x128xf32> to vector<1x128xf32>
    %96 = arith.addf %94, %95 : vector<1x128xf32>
    %cst_32 = arith.constant 0.000000e+00 : f32
    %97 = vector.broadcast %cst_32 : f32 to vector<1x128xf32>
    %98 = arith.maximumf %96, %97 : vector<1x128xf32>
    %99 = arith.mulf %92, %98 : vector<1x128xf32>
    %100 = arith.truncf %99 : vector<1x128xf32> to vector<1x128xbf16>
    %cst_33 = arith.constant dense<0.000000e+00> : vector<1x128xf32>
    %101 = tpu.matmul %100, %3, %cst_33 {dimension_numbers = #tpu.dot_dimension_numbers<[1], [0], [0], [1], [0, 0, 1, 1], [], []>} : vector<1x128xbf16>, vector<128x128xbf16>, vector<1x128xf32> -> vector<1x128xf32>
    %102 = vector.extract_strided_slice %12 {offsets = [5, 0], sizes = [1, 128], strides = [1, 1]} : vector<8x128xf32> to vector<1x128xf32>
    %103 = arith.addf %101, %102 : vector<1x128xf32>
    %104 = math.tanh %103 : vector<1x128xf32>
    %c64_i32_34 = arith.constant 64 : i32
    %105 = tpu.dynamic_rotate %98 by %c64_i32_34 dim 1 : vector<1x128xf32>, i32 -> vector<1x128xf32>
    %106 = arith.subf %104, %92 : vector<1x128xf32>
    %107 = arith.mulf %105, %106 : vector<1x128xf32>
    %108 = arith.addf %92, %107 : vector<1x128xf32>
    %109 = arith.truncf %108 : vector<1x128xf32> to vector<1x128xbf16>
    %cst_35 = arith.constant dense<0.000000e+00> : vector<1x128xf32>
    %110 = tpu.matmul %109, %1, %cst_35 {dimension_numbers = #tpu.dot_dimension_numbers<[1], [0], [0], [1], [0, 0, 1, 1], [], []>} : vector<1x128xbf16>, vector<128x128xbf16>, vector<1x128xf32> -> vector<1x128xf32>
    %111 = vector.extract_strided_slice %11 {offsets = [6, 0], sizes = [1, 128], strides = [1, 1]} : vector<8x128xf32> to vector<1x128xf32>
    %112 = arith.addf %110, %111 : vector<1x128xf32>
    %cst_36 = arith.constant 0.000000e+00 : f32
    %113 = vector.broadcast %cst_36 : f32 to vector<1x128xf32>
    %114 = arith.maximumf %112, %113 : vector<1x128xf32>
    %115 = arith.mulf %108, %114 : vector<1x128xf32>
    %116 = arith.truncf %115 : vector<1x128xf32> to vector<1x128xbf16>
    %cst_37 = arith.constant dense<0.000000e+00> : vector<1x128xf32>
    %117 = tpu.matmul %116, %3, %cst_37 {dimension_numbers = #tpu.dot_dimension_numbers<[1], [0], [0], [1], [0, 0, 1, 1], [], []>} : vector<1x128xbf16>, vector<128x128xbf16>, vector<1x128xf32> -> vector<1x128xf32>
    %118 = vector.extract_strided_slice %12 {offsets = [6, 0], sizes = [1, 128], strides = [1, 1]} : vector<8x128xf32> to vector<1x128xf32>
    %119 = arith.addf %117, %118 : vector<1x128xf32>
    %120 = math.tanh %119 : vector<1x128xf32>
    %c64_i32_38 = arith.constant 64 : i32
    %121 = tpu.dynamic_rotate %114 by %c64_i32_38 dim 1 : vector<1x128xf32>, i32 -> vector<1x128xf32>
    %122 = arith.subf %120, %108 : vector<1x128xf32>
    %123 = arith.mulf %121, %122 : vector<1x128xf32>
    %124 = arith.addf %108, %123 : vector<1x128xf32>
    %125 = arith.truncf %124 : vector<1x128xf32> to vector<1x128xbf16>
    %cst_39 = arith.constant dense<0.000000e+00> : vector<1x128xf32>
    %126 = tpu.matmul %125, %1, %cst_39 {dimension_numbers = #tpu.dot_dimension_numbers<[1], [0], [0], [1], [0, 0, 1, 1], [], []>} : vector<1x128xbf16>, vector<128x128xbf16>, vector<1x128xf32> -> vector<1x128xf32>
    %127 = vector.extract_strided_slice %11 {offsets = [7, 0], sizes = [1, 128], strides = [1, 1]} : vector<8x128xf32> to vector<1x128xf32>
    %128 = arith.addf %126, %127 : vector<1x128xf32>
    %cst_40 = arith.constant 0.000000e+00 : f32
    %129 = vector.broadcast %cst_40 : f32 to vector<1x128xf32>
    %130 = arith.maximumf %128, %129 : vector<1x128xf32>
    %131 = arith.mulf %124, %130 : vector<1x128xf32>
    %132 = arith.truncf %131 : vector<1x128xf32> to vector<1x128xbf16>
    %cst_41 = arith.constant dense<0.000000e+00> : vector<1x128xf32>
    %133 = tpu.matmul %132, %3, %cst_41 {dimension_numbers = #tpu.dot_dimension_numbers<[1], [0], [0], [1], [0, 0, 1, 1], [], []>} : vector<1x128xbf16>, vector<128x128xbf16>, vector<1x128xf32> -> vector<1x128xf32>
    %134 = vector.extract_strided_slice %12 {offsets = [7, 0], sizes = [1, 128], strides = [1, 1]} : vector<8x128xf32> to vector<1x128xf32>
    %135 = arith.addf %133, %134 : vector<1x128xf32>
    %136 = math.tanh %135 : vector<1x128xf32>
    %c64_i32_42 = arith.constant 64 : i32
    %137 = tpu.dynamic_rotate %130 by %c64_i32_42 dim 1 : vector<1x128xf32>, i32 -> vector<1x128xf32>
    %138 = arith.subf %136, %124 : vector<1x128xf32>
    %139 = arith.mulf %137, %138 : vector<1x128xf32>
    %140 = arith.addf %124, %139 : vector<1x128xf32>
    %c0_43 = arith.constant 0 : index
    %c0_44 = arith.constant 0 : index
    %141 = vector.load %arg3[%c0_43, %c0_44] : memref<1x128xf32, #tpu.memory_space<vmem>>, vector<1x128xf32>
    tpu.vector_store %arg3[%c0_43, %c0_44], %140 {strides = array<i32>} : memref<1x128xf32, #tpu.memory_space<vmem>>, vector<1x128xf32>,
    return
  }
  func.func @transform_0(%arg0: i32) -> (i32, i32) {
    %c0_i32 = arith.constant 0 : i32
    %c0_i32_0 = arith.constant 0 : i32
    %c0_i32_1 = arith.constant 0 : i32
    return %c0_i32, %c0_i32_0 : i32, i32
  }
  func.func @transform_1(%arg0: i32) -> (i32, i32, i32) {
    %c0_i32 = arith.constant 0 : i32
    %c0_i32_0 = arith.constant 0 : i32
    %c0_i32_1 = arith.constant 0 : i32
    %c0_i32_2 = arith.constant 0 : i32
    return %c0_i32, %c0_i32_0, %c0_i32_1 : i32, i32, i32
  }
  func.func @transform_2(%arg0: i32) -> (i32, i32) {
    %c0_i32 = arith.constant 0 : i32
    %c0_i32_0 = arith.constant 0 : i32
    %c0_i32_1 = arith.constant 0 : i32
    return %c0_i32, %c0_i32_0 : i32, i32
  }
}

</mosaic_0001>

<bundles_post_ra>
// kernel: rnn_forward.1
= control target key start
LH: loop header
LB: loop body
LE: loop exit
PB: predicated region body
PF: predicated region fallthrough
CT: control target
= control target key end

     0   :  { %7 = vsyncpa [#allocation3], 0  ;;  %s1753_s9 = smov [#allocation2]   ;;  %s2162_s0 = inlined_call_operand.vmem [shape: f32[9,128], index: 0, kind: input, shape index: {}]   ;;  %s2163_s1 = inlined_call_operand.hbm [shape: bf16[4,128,128], index: 1, kind: input, shape index: {}]   ;;  %s2164_s2 = inlined_call_operand.vmem [shape: f32[1,128], index: 2, kind: output, shape index: {}]  }
   0x1   :  { %s15_s10 = sshll.u32 %s1753_s9, 4  ;;  %s16_s10 = int_to_ptr.vmem [resolvable:$true] %s15_s10 }
   0x2   :  { %s1739_s11 = scalar_lea.vmem %s16_s10, 4096  ;;  %p1744_p1 = scmp.lt.s32.totalorder %s16_s10, %s16_s10 }
   0x3   :  { %p1740_p0 = scmp.ne.s32.totalorder %s16_s10, %s1739_s11  ;;  %p1745_p2 = scmp.lt.s32.totalorder %s1739_s11, %s1739_s11 }
   0x5   :  { %p1746_p3 = por %p1745_p2, %p1744_p1 }
   0x7   :  { %p1747_p4 = pnand %p1746_p3, %p1740_p0 }
   0x9   :  { %1750 = shalt.err (!%p1747_p4)
}
   0xa   :  { %s1754_s12 = smov 64   ;;  %s1755_s13 = smov 4  }
   0xb   :  { %21 = dma.hbm_to_vmem [thread:$0]  %s2163_s1, 4096, %s16_s10, [#allocation3], %s1754_s12, %s1754_s12, %s1755_s13  }
   0xc   :  { %1751 = dma.done.wait [#allocation3], 4096  }
   0xd   :  { %1752 = vsyncadd [#allocation3], 4294963200  ;;  %v1756_v0 = vmov 0.0   ;;  %vm1757_vm0 = vmmov 0   ;;  %v1683_v1 = vld [vmem:[#allocation2 + $0xb8] sm:$0xff]   ;;  %v1684_v2 = vld [vmem:[#allocation2 + $0xb0] sm:$0xff]  }
   0xe   :  { %1318 = vmatprep.subr.bf16.mxu0 %v1756_v0  ;;  %1334 = vmatprep.mubr.msk.bf16.mxu0 %vm1757_vm0, %v1756_v0  ;;  %v1685_v3 = vld [vmem:[#allocation2 + $0xa8] sm:$0xff]   ;;  %v1686_v4 = vld [vmem:[#allocation2 + $0xa0] sm:$0xff]   ;;  %v1687_v5 = vld [vmem:[#allocation2 + $0x98] sm:$0xff]  }
   0xf   :  { %1338 = vmatprep.subr.bf16.mxu1 %v1756_v0  ;;  %1354 = vmatprep.mubr.msk.bf16.mxu1 %vm1757_vm0, %v1756_v0  ;;  %v1699_v6 = vld [vmem:[#allocation2 + $0xf8] sm:$0xff]   ;;  %v1688_v7 = vld [vmem:[#allocation2 + $0x90] sm:$0xff]   ;;  %v1689_v9 = vld [vmem:[#allocation2 + $0x88] sm:$0xff]  }
  0x10   :  { %1319 = vmatpush3.bf16.msra.mxu0 %v1683_v1  ;;  %1339 = vmatpush3.bf16.msra.mxu1 %v1699_v6  ;;  %v1700_v8 = vld [vmem:[#allocation2 + $0xf0] sm:$0xff]   ;;  %v1701_v10 = vld [vmem:[#allocation2 + $0xe8] sm:$0xff]   ;;  %v1690_v11 = vld [vmem:[#allocation2 + $0x80] sm:$0xff]  }
  0x11   :  { %1320 = vmatprep.subr.bf16.mxu0 %v1756_v0  ;;  %1340 = vmatprep.subr.bf16.mxu1 %v1756_v0  ;;  %v93_v12 = vld [vmem:[%s2162_s0] sm:$0xff]  ;;  %v1797_v15 = vld [vmem:[#allocation2 + $0x38] sm:$0xff]   ;;  %v1802_v17 = vld [vmem:[#allocation2 + $0x30] sm:$0xff]  }
  0x12   :  { %v1702_v13 = vld [vmem:[#allocation2 + $0xe0] sm:$0xff]   ;;  %v94_v14 = vpack.c.bf16 %v93_v12, %v93_v12  ;;  %v1703_v16 = vld [vmem:[#allocation2 + $0xd8] sm:$0xff]   ;;  %v1704_v18 = vld [vmem:[#allocation2 + $0xd0] sm:$0xff]  }
  0x13   :  { %v1809_v19 = vld [vmem:[#allocation2 + $0x28] sm:$0xff]   ;;  %v1814_v21 = vld [vmem:[#allocation2 + $0x20] sm:$0xff]   ;;  %v1819_v22 = vld [vmem:[#allocation2 + $0x18] sm:$0xff]  }
  0x14   :  { %1321 = vmatpush3.bf16.msra.mxu0 %v1684_v2  ;;  %1341 = vmatpush3.bf16.msra.mxu1 %v1700_v8  ;;  %v1705_v20 = vld [vmem:[#allocation2 + $0xc8] sm:$0xff]   ;;  %v1823_v23 = vld [vmem:[#allocation2 + $0x10] sm:$0xff]   ;;  %v1831_v25 = vld [vmem:[#allocation2] sm:$0xff]  }
  0x15   :  { %1322 = vmatprep.subr.bf16.mxu0 %v1756_v0  ;;  %1342 = vmatprep.subr.bf16.mxu1 %v1756_v0  ;;  %v1827_v24 = vld [vmem:[#allocation2 + $0x8] sm:$0xff]   ;;  %v1706_v28 = vld [vmem:[#allocation2 + $0xc0] sm:$0xff]   ;;  %v1864_v29 = vld [vmem:[#allocation2 + $0x78] sm:$0xff]  }
  0x16   :  { %v1836_v26 = vld [vmem:[%s2162_s0 + $0x8] sm:$0x1]  ;;  %v1867_v30 = vld [vmem:[#allocation2 + $0x70] sm:$0xff]   ;;  %v1875_v32 = vld [vmem:[#allocation2 + $0x60] sm:$0xff]  }
  0x17   :  { %v272_v27 = vpack.c.bf16 %v1836_v26, %v1836_v26  ;;  %v1871_v31 = vld [vmem:[#allocation2 + $0x68] sm:$0xff]   ;;  %v1879_v33 = vld [vmem:[#allocation2 + $0x58] sm:$0xff]   ;;  %v1883_v34 = vld [vmem:[#allocation2 + $0x50] sm:$0xff]  }
  0x18   :  { %1323 = vmatpush3.bf16.msra.mxu0 %v1685_v3  ;;  %1343 = vmatpush3.bf16.msra.mxu1 %v1701_v10  ;;  %v1888_v35 = vld [vmem:[#allocation2 + $0x48] sm:$0xff]   ;;  %v1892_v36 = vld [vmem:[#allocation2 + $0x40] sm:$0xff]  }
  0x19   :  { %1324 = vmatprep.subr.bf16.mxu0 %v1756_v0  ;;  %1344 = vmatprep.subr.bf16.mxu1 %v1756_v0 }
  0x1c   :  { %1325 = vmatpush3.bf16.msra.mxu0 %v1686_v4  ;;  %1345 = vmatpush3.bf16.msra.mxu1 %v1702_v13 }
  0x1d   :  { %1326 = vmatprep.subr.bf16.mxu0 %v1756_v0  ;;  %1346 = vmatprep.subr.bf16.mxu1 %v1756_v0 }
  0x20   :  { %1327 = vmatpush3.bf16.msra.mxu0 %v1687_v5  ;;  %1347 = vmatpush3.bf16.msra.mxu1 %v1703_v16 }
  0x21   :  { %1328 = vmatprep.subr.bf16.mxu0 %v1756_v0  ;;  %1348 = vmatprep.subr.bf16.mxu1 %v1756_v0 }
  0x24   :  { %1329 = vmatpush3.bf16.msra.mxu0 %v1688_v7  ;;  %1349 = vmatpush3.bf16.msra.mxu1 %v1704_v18 }
  0x25   :  { %1330 = vmatprep.subr.bf16.mxu0 %v1756_v0  ;;  %1350 = vmatprep.subr.bf16.mxu1 %v1756_v0 }
  0x28   :  { %1331 = vmatpush3.bf16.msra.mxu0 %v1689_v9  ;;  %1351 = vmatpush3.bf16.msra.mxu1 %v1705_v20 }
  0x29   :  { %1332 = vmatprep.subr.bf16.mxu0 %v1756_v0  ;;  %1352 = vmatprep.subr.bf16.mxu1 %v1756_v0 }
  0x2c   :  { %1333 = vmatpush3.bf16.msra.mxu0 %v1690_v11  ;;  %1353 = vmatpush3.bf16.msra.mxu1 %v1706_v28 }
  0x2d   :  { %1358 = vmatprep.subr.bf16.mxu0 %v1756_v0  ;;  %1378 = vmatprep.subr.bf16.mxu1 %v1756_v0 }
  0x2f   :  { %1335 = vmatmul.mubr.bf16.vlgmr.msra.gmra.mxu0 %v94_v14  ;;  %1355 = vmatmul.mubr.bf16.vlgmr.msra.gmra.mxu1 %v94_v14 }
  0x30   :  { %1359 = vmatpush3.bf16.msra.mxu0 %v1797_v15  ;;  %1374 = vmatprep.mubr.msk.bf16.mxu0 %vm1757_vm0, %v1756_v0 }
  0x31   :  { %1360 = vmatprep.subr.bf16.mxu0 %v1756_v0  ;;  %1394 = vmatprep.mubr.msk.bf16.mxu1 %vm1757_vm0, %v1756_v0 }
  0x32   :  { %1379 = vmatpush3.bf16.msra.mxu1 %v1864_v29 }
  0x33   :  { %1380 = vmatprep.subr.bf16.mxu1 %v1756_v0 }
  0x34   :  { %1361 = vmatpush3.bf16.msra.mxu0 %v1802_v17 }
  0x35   :  { %1362 = vmatprep.subr.bf16.mxu0 %v1756_v0 }
  0x36   :  { %1381 = vmatpush3.bf16.msra.mxu1 %v1867_v30 }
  0x37   :  { %1382 = vmatprep.subr.bf16.mxu1 %v1756_v0 }
  0x38   :  { %1363 = vmatpush3.bf16.msra.mxu0 %v1809_v19 }
  0x39   :  { %1364 = vmatprep.subr.bf16.mxu0 %v1756_v0 }
  0x3a   :  { %1383 = vmatpush3.bf16.msra.mxu1 %v1871_v31 }
  0x3b   :  { %1384 = vmatprep.subr.bf16.mxu1 %v1756_v0 }
  0x3c   :  { %1365 = vmatpush3.bf16.msra.mxu0 %v1814_v21 }
  0x3d   :  { %1366 = vmatprep.subr.bf16.mxu0 %v1756_v0 }
  0x3e   :  { %1385 = vmatpush3.bf16.msra.mxu1 %v1875_v32 }
  0x3f   :  { %1386 = vmatprep.subr.bf16.mxu1 %v1756_v0 }
  0x40   :  { %1367 = vmatpush3.bf16.msra.mxu0 %v1819_v22 }
  0x41   :  { %1368 = vmatprep.subr.bf16.mxu0 %v1756_v0 }
  0x42   :  { %1387 = vmatpush3.bf16.msra.mxu1 %v1879_v33 }
  0x43   :  { %1388 = vmatprep.subr.bf16.mxu1 %v1756_v0 }
  0x44   :  { %1369 = vmatpush3.bf16.msra.mxu0 %v1823_v23 }
  0x45   :  { %1370 = vmatprep.subr.bf16.mxu0 %v1756_v0 }
  0x46   :  { %1389 = vmatpush3.bf16.msra.mxu1 %v1883_v34 }
  0x47   :  { %1390 = vmatprep.subr.bf16.mxu1 %v1756_v0 }
  0x48   :  { %1371 = vmatpush3.bf16.msra.mxu0 %v1827_v24 }
  0x49   :  { %1372 = vmatprep.subr.bf16.mxu0 %v1756_v0 }
  0x4a   :  { %1391 = vmatpush3.bf16.msra.mxu1 %v1888_v35 }
  0x4b   :  { %1392 = vmatprep.subr.bf16.mxu1 %v1756_v0 }
  0x4c   :  { %1373 = vmatpush3.bf16.msra.mxu0 %v1831_v25 }
  0x4d   :  { %1398 = vmatprep.subr.bf16.mxu0 %v1756_v0 }
  0x4e   :  { %1393 = vmatpush3.bf16.msra.mxu1 %v1892_v36 }
  0x4f   :  { %1375 = vmatmul.mubr.bf16.vlgmr.msra.gmra.mxu0 %v272_v27  ;;  %1418 = vmatprep.subr.bf16.mxu1 %v1756_v0 }
  0x50   :  { %1399 = vmatpush3.bf16.msra.mxu0 %v1797_v15  ;;  %1414 = vmatprep.mubr.msk.bf16.mxu0 %vm1757_vm0, %v1756_v0 }
  0x51   :  { %1400 = vmatprep.subr.bf16.mxu0 %v1756_v0 }
  0x54   :  { %1401 = vmatpush3.bf16.msra.mxu0 %v1802_v17 }
  0x55   :  { %1402 = vmatprep.subr.bf16.mxu0 %v1756_v0 }
  0x58   :  { %1403 = vmatpush3.bf16.msra.mxu0 %v1809_v19 }
  0x59   :  { %1404 = vmatprep.subr.bf16.mxu0 %v1756_v0 }
  0x5c   :  { %1405 = vmatpush3.bf16.msra.mxu0 %v1814_v21 }
  0x5d   :  { %1406 = vmatprep.subr.bf16.mxu0 %v1756_v0 }
  0x60   :  { %1407 = vmatpush3.bf16.msra.mxu0 %v1819_v22 }
  0x61   :  { %1408 = vmatprep.subr.bf16.mxu0 %v1756_v0 }
  0x64   :  { %1409 = vmatpush3.bf16.msra.mxu0 %v1823_v23 }
  0x65   :  { %1410 = vmatprep.subr.bf16.mxu0 %v1756_v0 }
  0x68   :  { %1411 = vmatpush3.bf16.msra.mxu0 %v1827_v24 }
  0x69   :  { %1412 = vmatprep.subr.bf16.mxu0 %v1756_v0 }
  0x6c   :  { %1413 = vmatpush3.bf16.msra.mxu0 %v1831_v25 }
  0x6d   :  { %1438 = vmatprep.subr.bf16.mxu0 %v1756_v0 }
  0xef   :  { %v1896_v37 = vpop.f32.mrf.mxu0  ;;  %v1917_v49 = vpop.f32.mrf.mxu1 }
  0xf0   :  { %v460_v1 = vrot.slane %v1896_v37, 1  ;;  %v506_v10 = vrot.slane %v1917_v49, 1 }
  0xf1   :  { %v1336_v38 = vpop.f32.mrf.mxu0  ;;  %v1356_v50 = vpop.f32.mrf.mxu1 }
  0xf3   :  { %v181_v39 = vpop.f32.mrf.mxu0  ;;  %v269_v51 = vpop.f32.mrf.mxu1 }
  0xf4   :  { %v555_v39 = vrot.slane %v1896_v37, 2 }
  0xf5   :  { %v1337_v40 = vpop.f32.mrf.mxu0  ;;  %v1357_v52 = vpop.f32.mrf.mxu1 }
 0x10f   :  { %v355_v41 = vpop.f32.mrf.mxu0 }
 0x110   :  { %v356_v42 = vadd.f32 %v355_v41, %v1896_v37 }
 0x111   :  { %v1376_v43 = vpop.f32.mrf.mxu0 }
 0x112   :  { %v361_v44 = vmax.f32 %v356_v42, 0.0 }
 0x113   :  { %v358_v45 = vpop.f32.mrf.mxu0 }
 0x114   :  { %v362_v46 = vmul.f32 %v361_v44, %v1836_v26  ;;  %453 = vrot.lane.b32.xlu0 %v361_v44, %s1754_s12 }
 0x115   :  { %v1377_v47 = vpop.f32.mrf.mxu0 }
 0x116   :  { %v363_v48 = vpack.c.bf16 %v362_v46, %v362_v46 }
 0x118   :  { %1395 = vmatmul.mubr.bf16.vlgmr.msra.gmra.mxu1 %v363_v48  ;;  %v600_v48 = vrot.slane %v1917_v49, 2 }
 0x119   :  { %1419 = vmatpush3.bf16.msra.mxu1 %v1864_v29  ;;  %1434 = vmatprep.mubr.msk.bf16.mxu1 %vm1757_vm0, %v1756_v0 }
 0x11a   :  { %1420 = vmatprep.subr.bf16.mxu1 %v1756_v0 }
 0x11d   :  { %1421 = vmatpush3.bf16.msra.mxu1 %v1867_v30 }
 0x11e   :  { %1422 = vmatprep.subr.bf16.mxu1 %v1756_v0 }
 0x121   :  { %1423 = vmatpush3.bf16.msra.mxu1 %v1871_v31 }
 0x122   :  { %1424 = vmatprep.subr.bf16.mxu1 %v1756_v0 }
 0x125   :  { %1425 = vmatpush3.bf16.msra.mxu1 %v1875_v32 }
 0x126   :  { %1426 = vmatprep.subr.bf16.mxu1 %v1756_v0 }
 0x129   :  { %1427 = vmatpush3.bf16.msra.mxu1 %v1879_v33 }
 0x12a   :  { %1428 = vmatprep.subr.bf16.mxu1 %v1756_v0 }
 0x12d   :  { %1429 = vmatpush3.bf16.msra.mxu1 %v1883_v34 }
 0x12e   :  { %1430 = vmatprep.subr.bf16.mxu1 %v1756_v0 }
 0x131   :  { %1431 = vmatpush3.bf16.msra.mxu1 %v1888_v35 }
 0x132   :  { %1432 = vmatprep.subr.bf16.mxu1 %v1756_v0 }
 0x135   :  { %1433 = vmatpush3.bf16.msra.mxu1 %v1892_v36 }
 0x136   :  { %1458 = vmatprep.subr.bf16.mxu1 %v1756_v0 }
 0x186   :  { %v454_v60 = vpop.permute.xlu0 %453 }
 0x1d8   :  { %v446_v53 = vpop.f32.mrf.mxu1 }
 0x1d9   :  { %v447_v54 = vadd.f32 %v446_v53, %v1917_v49 }
 0x1da   :  { %v1396_v55 = vpop.f32.mrf.mxu1 }
 0x1db   :  { %1715 = vtanh.f32 %v447_v54 }
 0x1dc   :  { %v449_v56 = vpop.f32.mrf.mxu1 }
 0x1de   :  { %v1397_v57 = vpop.f32.mrf.mxu1 }
 0x1e8   :  { %v1716_v58 = vpop.eup %1715 }
 0x1e9   :  { %v455_v59 = vsub.f32 %v1716_v58, %v1836_v26 }
 0x1eb   :  { %v456_v61 = vmul.f32 %v455_v59, %v454_v60 }
 0x1ed   :  { %v457_v62 = vadd.f32 %v456_v61, %v1836_v26  ;;  %v649_v61 = vrot.slane %v1896_v37, 3 }
 0x1ef   :  { %v458_v63 = vpack.c.bf16 %v457_v62, %v457_v62 }
 0x1f1   :  { %1415 = vmatmul.mubr.bf16.vlgmr.msra.gmra.mxu0 %v458_v63 }
 0x1f2   :  { %1439 = vmatpush3.bf16.msra.mxu0 %v1797_v15  ;;  %1454 = vmatprep.mubr.msk.bf16.mxu0 %vm1757_vm0, %v1756_v0 }
 0x1f3   :  { %1440 = vmatprep.subr.bf16.mxu0 %v1756_v0 }
 0x1f6   :  { %1441 = vmatpush3.bf16.msra.mxu0 %v1802_v17 }
 0x1f7   :  { %1442 = vmatprep.subr.bf16.mxu0 %v1756_v0 }
 0x1fa   :  { %1443 = vmatpush3.bf16.msra.mxu0 %v1809_v19 }
 0x1fb   :  { %1444 = vmatprep.subr.bf16.mxu0 %v1756_v0 }
 0x1fe   :  { %1445 = vmatpush3.bf16.msra.mxu0 %v1814_v21 }
 0x1ff   :  { %1446 = vmatprep.subr.bf16.mxu0 %v1756_v0 }
 0x202   :  { %1447 = vmatpush3.bf16.msra.mxu0 %v1819_v22 }
 0x203   :  { %1448 = vmatprep.subr.bf16.mxu0 %v1756_v0 }
 0x206   :  { %1449 = vmatpush3.bf16.msra.mxu0 %v1823_v23 }
 0x207   :  { %1450 = vmatprep.subr.bf16.mxu0 %v1756_v0 }
 0x20a   :  { %1451 = vmatpush3.bf16.msra.mxu0 %v1827_v24 }
 0x20b   :  { %1452 = vmatprep.subr.bf16.mxu0 %v1756_v0 }
 0x20e   :  { %1453 = vmatpush3.bf16.msra.mxu0 %v1831_v25 }
 0x20f   :  { %1478 = vmatprep.subr.bf16.mxu0 %v1756_v0 }
 0x2b1   :  { %v496_v2 = vpop.f32.mrf.mxu0 }
 0x2b2   :  { %v497_v3 = vadd.f32 %v496_v2, %v460_v1 }
 0x2b3   :  { %v1416_v4 = vpop.f32.mrf.mxu0 }
 0x2b4   :  { %v502_v5 = vmax.f32 %v497_v3, 0.0 }
 0x2b5   :  { %v499_v6 = vpop.f32.mrf.mxu0 }
 0x2b6   :  { %v503_v7 = vmul.f32 %v502_v5, %v457_v62  ;;  %549 = vrot.lane.b32.xlu0 %v502_v5, %s1754_s12 }
 0x2b7   :  { %v1417_v8 = vpop.f32.mrf.mxu0 }
 0x2b8   :  { %v504_v9 = vpack.c.bf16 %v503_v7, %v503_v7  ;;  %v694_v7 = vrot.slane %v1917_v49, 3 }
 0x2ba   :  { %1435 = vmatmul.mubr.bf16.vlgmr.msra.gmra.mxu1 %v504_v9 }
 0x2bb   :  { %1459 = vmatpush3.bf16.msra.mxu1 %v1864_v29  ;;  %1474 = vmatprep.mubr.msk.bf16.mxu1 %vm1757_vm0, %v1756_v0 }
 0x2bc   :  { %1460 = vmatprep.subr.bf16.mxu1 %v1756_v0 }
 0x2bf   :  { %1461 = vmatpush3.bf16.msra.mxu1 %v1867_v30 }
 0x2c0   :  { %1462 = vmatprep.subr.bf16.mxu1 %v1756_v0 }
 0x2c3   :  { %1463 = vmatpush3.bf16.msra.mxu1 %v1871_v31 }
 0x2c4   :  { %1464 = vmatprep.subr.bf16.mxu1 %v1756_v0 }
 0x2c7   :  { %1465 = vmatpush3.bf16.msra.mxu1 %v1875_v32 }
 0x2c8   :  { %1466 = vmatprep.subr.bf16.mxu1 %v1756_v0 }
 0x2cb   :  { %1467 = vmatpush3.bf16.msra.mxu1 %v1879_v33 }
 0x2cc   :  { %1468 = vmatprep.subr.bf16.mxu1 %v1756_v0 }
 0x2cf   :  { %1469 = vmatpush3.bf16.msra.mxu1 %v1883_v34 }
 0x2d0   :  { %1470 = vmatprep.subr.bf16.mxu1 %v1756_v0 }
 0x2d3   :  { %1471 = vmatpush3.bf16.msra.mxu1 %v1888_v35 }
 0x2d4   :  { %1472 = vmatprep.subr.bf16.mxu1 %v1756_v0 }
 0x2d7   :  { %1473 = vmatpush3.bf16.msra.mxu1 %v1892_v36 }
 0x2d8   :  { %1498 = vmatprep.subr.bf16.mxu1 %v1756_v0 }
 0x328   :  { %v550_v26 = vpop.permute.xlu0 %549 }
 0x37a   :  { %v542_v11 = vpop.f32.mrf.mxu1 }
 0x37b   :  { %v543_v12 = vadd.f32 %v542_v11, %v506_v10 }
 0x37c   :  { %v1436_v13 = vpop.f32.mrf.mxu1 }
 0x37d   :  { %1717 = vtanh.f32 %v543_v12 }
 0x37e   :  { %v545_v14 = vpop.f32.mrf.mxu1 }
 0x380   :  { %v1437_v16 = vpop.f32.mrf.mxu1 }
 0x38a   :  { %v1718_v18 = vpop.eup %1717 }
 0x38b   :  { %v551_v20 = vsub.f32 %v1718_v18, %v457_v62 }
 0x38d   :  { %v552_v27 = vmul.f32 %v551_v20, %v550_v26 }
 0x38f   :  { %v553_v28 = vadd.f32 %v552_v27, %v457_v62  ;;  %v743_v27 = vrot.slane %v1896_v37, 4 }
 0x391   :  { %v554_v38 = vpack.c.bf16 %v553_v28, %v553_v28 }
 0x393   :  { %1455 = vmatmul.mubr.bf16.vlgmr.msra.gmra.mxu0 %v554_v38 }
 0x394   :  { %1479 = vmatpush3.bf16.msra.mxu0 %v1797_v15  ;;  %1494 = vmatprep.mubr.msk.bf16.mxu0 %vm1757_vm0, %v1756_v0 }
 0x395   :  { %1480 = vmatprep.subr.bf16.mxu0 %v1756_v0 }
 0x398   :  { %1481 = vmatpush3.bf16.msra.mxu0 %v1802_v17 }
 0x399   :  { %1482 = vmatprep.subr.bf16.mxu0 %v1756_v0 }
 0x39c   :  { %1483 = vmatpush3.bf16.msra.mxu0 %v1809_v19 }
 0x39d   :  { %1484 = vmatprep.subr.bf16.mxu0 %v1756_v0 }
 0x3a0   :  { %1485 = vmatpush3.bf16.msra.mxu0 %v1814_v21 }
 0x3a1   :  { %1486 = vmatprep.subr.bf16.mxu0 %v1756_v0 }
 0x3a4   :  { %1487 = vmatpush3.bf16.msra.mxu0 %v1819_v22 }
 0x3a5   :  { %1488 = vmatprep.subr.bf16.mxu0 %v1756_v0 }
 0x3a8   :  { %1489 = vmatpush3.bf16.msra.mxu0 %v1823_v23 }
 0x3a9   :  { %1490 = vmatprep.subr.bf16.mxu0 %v1756_v0 }
 0x3ac   :  { %1491 = vmatpush3.bf16.msra.mxu0 %v1827_v24 }
 0x3ad   :  { %1492 = vmatprep.subr.bf16.mxu0 %v1756_v0 }
 0x3b0   :  { %1493 = vmatpush3.bf16.msra.mxu0 %v1831_v25 }
 0x3b1   :  { %1518 = vmatprep.subr.bf16.mxu0 %v1756_v0 }
 0x453   :  { %v591_v40 = vpop.f32.mrf.mxu0 }
 0x454   :  { %v592_v41 = vadd.f32 %v591_v40, %v555_v39 }
 0x455   :  { %v1456_v42 = vpop.f32.mrf.mxu0 }
 0x456   :  { %v597_v43 = vmax.f32 %v592_v41, 0.0 }
 0x457   :  { %v594_v44 = vpop.f32.mrf.mxu0 }
 0x458   :  { %v598_v45 = vmul.f32 %v597_v43, %v553_v28  ;;  %643 = vrot.lane.b32.xlu1 %v597_v43, %s1754_s12 }
 0x459   :  { %v1457_v46 = vpop.f32.mrf.mxu0 }
 0x45a   :  { %v599_v47 = vpack.c.bf16 %v598_v45, %v598_v45  ;;  %v788_v45 = vrot.slane %v1917_v49, 4 }
 0x45c   :  { %1475 = vmatmul.mubr.bf16.vlgmr.msra.gmra.mxu1 %v599_v47 }
 0x45d   :  { %1499 = vmatpush3.bf16.msra.mxu1 %v1864_v29  ;;  %1514 = vmatprep.mubr.msk.bf16.mxu1 %vm1757_vm0, %v1756_v0 }
 0x45e   :  { %1500 = vmatprep.subr.bf16.mxu1 %v1756_v0 }
 0x461   :  { %1501 = vmatpush3.bf16.msra.mxu1 %v1867_v30 }
 0x462   :  { %1502 = vmatprep.subr.bf16.mxu1 %v1756_v0 }
 0x465   :  { %1503 = vmatpush3.bf16.msra.mxu1 %v1871_v31 }
 0x466   :  { %1504 = vmatprep.subr.bf16.mxu1 %v1756_v0 }
 0x469   :  { %1505 = vmatpush3.bf16.msra.mxu1 %v1875_v32 }
 0x46a   :  { %1506 = vmatprep.subr.bf16.mxu1 %v1756_v0 }
 0x46d   :  { %1507 = vmatpush3.bf16.msra.mxu1 %v1879_v33 }
 0x46e   :  { %1508 = vmatprep.subr.bf16.mxu1 %v1756_v0 }
 0x471   :  { %1509 = vmatpush3.bf16.msra.mxu1 %v1883_v34 }
 0x472   :  { %1510 = vmatprep.subr.bf16.mxu1 %v1756_v0 }
 0x475   :  { %1511 = vmatpush3.bf16.msra.mxu1 %v1888_v35 }
 0x476   :  { %1512 = vmatprep.subr.bf16.mxu1 %v1756_v0 }
 0x479   :  { %1513 = vmatpush3.bf16.msra.mxu1 %v1892_v36 }
 0x47a   :  { %1538 = vmatprep.subr.bf16.mxu1 %v1756_v0 }
 0x4ca   :  { %v644_v57 = vpop.permute.xlu1 %643 }
 0x51c   :  { %v636_v50 = vpop.f32.mrf.mxu1 }
 0x51d   :  { %v637_v51 = vadd.f32 %v636_v50, %v600_v48 }
 0x51e   :  { %v1476_v52 = vpop.f32.mrf.mxu1 }
 0x51f   :  { %1719 = vtanh.f32 %v637_v51 }
 0x520   :  { %v639_v53 = vpop.f32.mrf.mxu1 }
 0x522   :  { %v1477_v54 = vpop.f32.mrf.mxu1 }
 0x52c   :  { %v1720_v55 = vpop.eup %1719 }
 0x52d   :  { %v645_v56 = vsub.f32 %v1720_v55, %v553_v28 }
 0x52f   :  { %v646_v58 = vmul.f32 %v645_v56, %v644_v57 }
 0x531   :  { %v647_v59 = vadd.f32 %v646_v58, %v553_v28  ;;  %v837_v58 = vrot.slane %v1896_v37, 5 }
 0x533   :  { %v648_v60 = vpack.c.bf16 %v647_v59, %v647_v59 }
 0x535   :  { %1495 = vmatmul.mubr.bf16.vlgmr.msra.gmra.mxu0 %v648_v60 }
 0x536   :  { %1519 = vmatpush3.bf16.msra.mxu0 %v1797_v15  ;;  %1534 = vmatprep.mubr.msk.bf16.mxu0 %vm1757_vm0, %v1756_v0 }
 0x537   :  { %1520 = vmatprep.subr.bf16.mxu0 %v1756_v0 }
 0x53a   :  { %1521 = vmatpush3.bf16.msra.mxu0 %v1802_v17 }
 0x53b   :  { %1522 = vmatprep.subr.bf16.mxu0 %v1756_v0 }
 0x53e   :  { %1523 = vmatpush3.bf16.msra.mxu0 %v1809_v19 }
 0x53f   :  { %1524 = vmatprep.subr.bf16.mxu0 %v1756_v0 }
 0x542   :  { %1525 = vmatpush3.bf16.msra.mxu0 %v1814_v21 }
 0x543   :  { %1526 = vmatprep.subr.bf16.mxu0 %v1756_v0 }
 0x546   :  { %1527 = vmatpush3.bf16.msra.mxu0 %v1819_v22 }
 0x547   :  { %1528 = vmatprep.subr.bf16.mxu0 %v1756_v0 }
 0x54a   :  { %1529 = vmatpush3.bf16.msra.mxu0 %v1823_v23 }
 0x54b   :  { %1530 = vmatprep.subr.bf16.mxu0 %v1756_v0 }
 0x54e   :  { %1531 = vmatpush3.bf16.msra.mxu0 %v1827_v24 }
 0x54f   :  { %1532 = vmatprep.subr.bf16.mxu0 %v1756_v0 }
 0x552   :  { %1533 = vmatpush3.bf16.msra.mxu0 %v1831_v25 }
 0x553   :  { %1558 = vmatprep.subr.bf16.mxu0 %v1756_v0 }
 0x5f5   :  { %v685_v62 = vpop.f32.mrf.mxu0 }
 0x5f6   :  { %v686_v63 = vadd.f32 %v685_v62, %v649_v61 }
 0x5f7   :  { %v1496_v1 = vpop.f32.mrf.mxu0 }
 0x5f8   :  { %v691_v2 = vmax.f32 %v686_v63, 0.0 }
 0x5f9   :  { %v688_v3 = vpop.f32.mrf.mxu0 }
 0x5fa   :  { %v692_v4 = vmul.f32 %v691_v2, %v647_v59  ;;  %737 = vrot.lane.b32.xlu1 %v691_v2, %s1754_s12 }
 0x5fb   :  { %v1497_v5 = vpop.f32.mrf.mxu0 }
 0x5fc   :  { %v693_v6 = vpack.c.bf16 %v692_v4, %v692_v4  ;;  %v882_v4 = vrot.slane %v1917_v49, 5 }
 0x5fe   :  { %1515 = vmatmul.mubr.bf16.vlgmr.msra.gmra.mxu1 %v693_v6 }
 0x5ff   :  { %1539 = vmatpush3.bf16.msra.mxu1 %v1864_v29  ;;  %1554 = vmatprep.mubr.msk.bf16.mxu1 %vm1757_vm0, %v1756_v0 }
 0x600   :  { %1540 = vmatprep.subr.bf16.mxu1 %v1756_v0 }
 0x603   :  { %1541 = vmatpush3.bf16.msra.mxu1 %v1867_v30 }
 0x604   :  { %1542 = vmatprep.subr.bf16.mxu1 %v1756_v0 }
 0x607   :  { %1543 = vmatpush3.bf16.msra.mxu1 %v1871_v31 }
 0x608   :  { %1544 = vmatprep.subr.bf16.mxu1 %v1756_v0 }
 0x60b   :  { %1545 = vmatpush3.bf16.msra.mxu1 %v1875_v32 }
 0x60c   :  { %1546 = vmatprep.subr.bf16.mxu1 %v1756_v0 }
 0x60f   :  { %1547 = vmatpush3.bf16.msra.mxu1 %v1879_v33 }
 0x610   :  { %1548 = vmatprep.subr.bf16.mxu1 %v1756_v0 }
 0x613   :  { %1549 = vmatpush3.bf16.msra.mxu1 %v1883_v34 }
 0x614   :  { %1550 = vmatprep.subr.bf16.mxu1 %v1756_v0 }
 0x617   :  { %1551 = vmatpush3.bf16.msra.mxu1 %v1888_v35 }
 0x618   :  { %1552 = vmatprep.subr.bf16.mxu1 %v1756_v0 }
 0x61b   :  { %1553 = vmatpush3.bf16.msra.mxu1 %v1892_v36 }
 0x61c   :  { %1578 = vmatprep.subr.bf16.mxu1 %v1756_v0 }
 0x66c   :  { %v738_v16 = vpop.permute.xlu1 %737 }
 0x6be   :  { %v730_v8 = vpop.f32.mrf.mxu1 }
 0x6bf   :  { %v731_v9 = vadd.f32 %v730_v8, %v694_v7 }
 0x6c0   :  { %v1516_v10 = vpop.f32.mrf.mxu1 }
 0x6c1   :  { %1721 = vtanh.f32 %v731_v9 }
 0x6c2   :  { %v733_v11 = vpop.f32.mrf.mxu1 }
 0x6c4   :  { %v1517_v12 = vpop.f32.mrf.mxu1 }
 0x6ce   :  { %v1722_v13 = vpop.eup %1721 }
 0x6cf   :  { %v739_v14 = vsub.f32 %v1722_v13, %v647_v59 }
 0x6d1   :  { %v740_v18 = vmul.f32 %v739_v14, %v738_v16 }
 0x6d3   :  { %v741_v20 = vadd.f32 %v740_v18, %v647_v59 }
 0x6d5   :  { %v742_v26 = vpack.c.bf16 %v741_v20, %v741_v20 }
 0x6d7   :  { %1535 = vmatmul.mubr.bf16.vlgmr.msra.gmra.mxu0 %v742_v26 }
 0x6d8   :  { %1559 = vmatpush3.bf16.msra.mxu0 %v1797_v15  ;;  %1574 = vmatprep.mubr.msk.bf16.mxu0 %vm1757_vm0, %v1756_v0 }
 0x6d9   :  { %1560 = vmatprep.subr.bf16.mxu0 %v1756_v0 }
 0x6dc   :  { %1561 = vmatpush3.bf16.msra.mxu0 %v1802_v17 }
 0x6dd   :  { %1562 = vmatprep.subr.bf16.mxu0 %v1756_v0 }
 0x6e0   :  { %1563 = vmatpush3.bf16.msra.mxu0 %v1809_v19 }
 0x6e1   :  { %1564 = vmatprep.subr.bf16.mxu0 %v1756_v0 }
 0x6e4   :  { %1565 = vmatpush3.bf16.msra.mxu0 %v1814_v21 }
 0x6e5   :  { %1566 = vmatprep.subr.bf16.mxu0 %v1756_v0 }
 0x6e8   :  { %1567 = vmatpush3.bf16.msra.mxu0 %v1819_v22 }
 0x6e9   :  { %1568 = vmatprep.subr.bf16.mxu0 %v1756_v0 }
 0x6ec   :  { %1569 = vmatpush3.bf16.msra.mxu0 %v1823_v23 }
 0x6ed   :  { %1570 = vmatprep.subr.bf16.mxu0 %v1756_v0 }
 0x6f0   :  { %1571 = vmatpush3.bf16.msra.mxu0 %v1827_v24 }
 0x6f1   :  { %1572 = vmatprep.subr.bf16.mxu0 %v1756_v0 }
 0x6f4   :  { %1573 = vmatpush3.bf16.msra.mxu0 %v1831_v25 }
 0x6f5   :  { %1598 = vmatprep.subr.bf16.mxu0 %v1756_v0 }
 0x797   :  { %v779_v28 = vpop.f32.mrf.mxu0 }
 0x798   :  { %v780_v38 = vadd.f32 %v779_v28, %v743_v27 }
 0x799   :  { %v1536_v39 = vpop.f32.mrf.mxu0 }
 0x79a   :  { %v785_v40 = vmax.f32 %v780_v38, 0.0 }
 0x79b   :  { %v782_v41 = vpop.f32.mrf.mxu0 }
 0x79c   :  { %v786_v42 = vmul.f32 %v785_v40, %v741_v20  ;;  %831 = vrot.lane.b32.xlu0 %v785_v40, %s1754_s12 }
 0x79d   :  { %v1537_v43 = vpop.f32.mrf.mxu0 }
 0x79e   :  { %v787_v44 = vpack.c.bf16 %v786_v42, %v786_v42 }
 0x7a0   :  { %1555 = vmatmul.mubr.bf16.vlgmr.msra.gmra.mxu1 %v787_v44 }
 0x7a1   :  { %1579 = vmatpush3.bf16.msra.mxu1 %v1864_v29  ;;  %1594 = vmatprep.mubr.msk.bf16.mxu1 %vm1757_vm0, %v1756_v0 }
 0x7a2   :  { %1580 = vmatprep.subr.bf16.mxu1 %v1756_v0 }
 0x7a5   :  { %1581 = vmatpush3.bf16.msra.mxu1 %v1867_v30 }
 0x7a6   :  { %1582 = vmatprep.subr.bf16.mxu1 %v1756_v0 }
 0x7a9   :  { %1583 = vmatpush3.bf16.msra.mxu1 %v1871_v31 }
 0x7aa   :  { %1584 = vmatprep.subr.bf16.mxu1 %v1756_v0 }
 0x7ad   :  { %1585 = vmatpush3.bf16.msra.mxu1 %v1875_v32 }
 0x7ae   :  { %1586 = vmatprep.subr.bf16.mxu1 %v1756_v0 }
 0x7b1   :  { %1587 = vmatpush3.bf16.msra.mxu1 %v1879_v33 }
 0x7b2   :  { %1588 = vmatprep.subr.bf16.mxu1 %v1756_v0 }
 0x7b5   :  { %1589 = vmatpush3.bf16.msra.mxu1 %v1883_v34 }
 0x7b6   :  { %1590 = vmatprep.subr.bf16.mxu1 %v1756_v0 }
 0x7b9   :  { %1591 = vmatpush3.bf16.msra.mxu1 %v1888_v35 }
 0x7ba   :  { %1592 = vmatprep.subr.bf16.mxu1 %v1756_v0 }
 0x7bd   :  { %1593 = vmatpush3.bf16.msra.mxu1 %v1892_v36 }
 0x7be   :  { %1618 = vmatprep.subr.bf16.mxu1 %v1756_v0 }
 0x80e   :  { %v832_v54 = vpop.permute.xlu0 %831 }
 0x860   :  { %v824_v46 = vpop.f32.mrf.mxu1 }
 0x861   :  { %v825_v47 = vadd.f32 %v824_v46, %v788_v45  ;;  %v1070_v46 = vrot.slane %v1917_v49, 7 }
 0x862   :  { %v1556_v48 = vpop.f32.mrf.mxu1 }
 0x863   :  { %1723 = vtanh.f32 %v825_v47 }
 0x864   :  { %v827_v50 = vpop.f32.mrf.mxu1 }
 0x866   :  { %v1557_v51 = vpop.f32.mrf.mxu1 }
 0x870   :  { %v1724_v52 = vpop.eup %1723 }
 0x871   :  { %v833_v53 = vsub.f32 %v1724_v52, %v741_v20 }
 0x873   :  { %v834_v55 = vmul.f32 %v833_v53, %v832_v54 }
 0x875   :  { %v835_v56 = vadd.f32 %v834_v55, %v741_v20 }
 0x877   :  { %v836_v57 = vpack.c.bf16 %v835_v56, %v835_v56 }
 0x879   :  { %1575 = vmatmul.mubr.bf16.vlgmr.msra.gmra.mxu0 %v836_v57 }
 0x87a   :  { %1599 = vmatpush3.bf16.msra.mxu0 %v1797_v15  ;;  %1614 = vmatprep.mubr.msk.bf16.mxu0 %vm1757_vm0, %v1756_v0 }
 0x87b   :  { %1600 = vmatprep.subr.bf16.mxu0 %v1756_v0 }
 0x87e   :  { %1601 = vmatpush3.bf16.msra.mxu0 %v1802_v17 }
 0x87f   :  { %1602 = vmatprep.subr.bf16.mxu0 %v1756_v0 }
 0x882   :  { %1603 = vmatpush3.bf16.msra.mxu0 %v1809_v19 }
 0x883   :  { %1604 = vmatprep.subr.bf16.mxu0 %v1756_v0 }
 0x886   :  { %1605 = vmatpush3.bf16.msra.mxu0 %v1814_v21 }
 0x887   :  { %1606 = vmatprep.subr.bf16.mxu0 %v1756_v0 }
 0x88a   :  { %1607 = vmatpush3.bf16.msra.mxu0 %v1819_v22 }
 0x88b   :  { %1608 = vmatprep.subr.bf16.mxu0 %v1756_v0 }
 0x88e   :  { %1609 = vmatpush3.bf16.msra.mxu0 %v1823_v23 }
 0x88f   :  { %1610 = vmatprep.subr.bf16.mxu0 %v1756_v0 }
 0x892   :  { %1611 = vmatpush3.bf16.msra.mxu0 %v1827_v24 }
 0x893   :  { %1612 = vmatprep.subr.bf16.mxu0 %v1756_v0 }
 0x896   :  { %1613 = vmatpush3.bf16.msra.mxu0 %v1831_v25 }
 0x897   :  { %1638 = vmatprep.subr.bf16.mxu0 %v1756_v0 }
 0x939   :  { %v873_v59 = vpop.f32.mrf.mxu0 }
 0x93a   :  { %v874_v60 = vadd.f32 %v873_v59, %v837_v58 }
 0x93b   :  { %v1576_v61 = vpop.f32.mrf.mxu0 }
 0x93c   :  { %v879_v62 = vmax.f32 %v874_v60, 0.0 }
 0x93d   :  { %v876_v63 = vpop.f32.mrf.mxu0 }
 0x93e   :  { %v880_v1 = vmul.f32 %v879_v62, %v835_v56  ;;  %925 = vrot.lane.b32.xlu1 %v879_v62, %s1754_s12 }
 0x93f   :  { %v1577_v2 = vpop.f32.mrf.mxu0 }
 0x940   :  { %v881_v3 = vpack.c.bf16 %v880_v1, %v880_v1 }
 0x942   :  { %1595 = vmatmul.mubr.bf16.vlgmr.msra.gmra.mxu1 %v881_v3 }
 0x943   :  { %1619 = vmatpush3.bf16.msra.mxu1 %v1864_v29  ;;  %1634 = vmatprep.mubr.msk.bf16.mxu1 %vm1757_vm0, %v1756_v0 }
 0x944   :  { %1620 = vmatprep.subr.bf16.mxu1 %v1756_v0 }
 0x947   :  { %1621 = vmatpush3.bf16.msra.mxu1 %v1867_v30 }
 0x948   :  { %1622 = vmatprep.subr.bf16.mxu1 %v1756_v0 }
 0x94b   :  { %1623 = vmatpush3.bf16.msra.mxu1 %v1871_v31 }
 0x94c   :  { %1624 = vmatprep.subr.bf16.mxu1 %v1756_v0 }
 0x94f   :  { %1625 = vmatpush3.bf16.msra.mxu1 %v1875_v32 }
 0x950   :  { %1626 = vmatprep.subr.bf16.mxu1 %v1756_v0 }
 0x953   :  { %1627 = vmatpush3.bf16.msra.mxu1 %v1879_v33 }
 0x954   :  { %1628 = vmatprep.subr.bf16.mxu1 %v1756_v0 }
 0x957   :  { %1629 = vmatpush3.bf16.msra.mxu1 %v1883_v34 }
 0x958   :  { %1630 = vmatprep.subr.bf16.mxu1 %v1756_v0 }
 0x95b   :  { %1631 = vmatpush3.bf16.msra.mxu1 %v1888_v35 }
 0x95c   :  { %1632 = vmatprep.subr.bf16.mxu1 %v1756_v0 }
 0x95f   :  { %1633 = vmatpush3.bf16.msra.mxu1 %v1892_v36 }
 0x960   :  { %1658 = vmatprep.subr.bf16.mxu1 %v1756_v0 }
 0x9b0   :  { %v926_v12 = vpop.permute.xlu1 %925 }
 0xa02   :  { %v918_v5 = vpop.f32.mrf.mxu1 }
 0xa03   :  { %v919_v6 = vadd.f32 %v918_v5, %v882_v4 }
 0xa04   :  { %v1596_v7 = vpop.f32.mrf.mxu1 }
 0xa05   :  { %1725 = vtanh.f32 %v919_v6 }
 0xa06   :  { %v921_v8 = vpop.f32.mrf.mxu1 }
 0xa08   :  { %v1597_v9 = vpop.f32.mrf.mxu1 }
 0xa12   :  { %v1726_v10 = vpop.eup %1725 }
 0xa13   :  { %v927_v11 = vsub.f32 %v1726_v10, %v835_v56 }
 0xa15   :  { %v928_v13 = vmul.f32 %v927_v11, %v926_v12 }
 0xa17   :  { %v929_v14 = vadd.f32 %v928_v13, %v835_v56 }
 0xa19   :  { %v930_v16 = vpack.c.bf16 %v929_v14, %v929_v14 }
 0xa1b   :  { %1615 = vmatmul.mubr.bf16.vlgmr.msra.gmra.mxu0 %v930_v16 }
 0xa1c   :  { %1639 = vmatpush3.bf16.msra.mxu0 %v1797_v15  ;;  %1654 = vmatprep.mubr.msk.bf16.mxu0 %vm1757_vm0, %v1756_v0  ;;  %v931_v15 = vrot.slane %v1896_v37, 6 }
 0xa1d   :  { %1640 = vmatprep.subr.bf16.mxu0 %v1756_v0 }
 0xa20   :  { %1641 = vmatpush3.bf16.msra.mxu0 %v1802_v17 }
 0xa21   :  { %1642 = vmatprep.subr.bf16.mxu0 %v1756_v0 }
 0xa24   :  { %1643 = vmatpush3.bf16.msra.mxu0 %v1809_v19 }
 0xa25   :  { %1644 = vmatprep.subr.bf16.mxu0 %v1756_v0 }
 0xa28   :  { %1645 = vmatpush3.bf16.msra.mxu0 %v1814_v21 }
 0xa29   :  { %1646 = vmatprep.subr.bf16.mxu0 %v1756_v0 }
 0xa2c   :  { %1647 = vmatpush3.bf16.msra.mxu0 %v1819_v22 }
 0xa2d   :  { %1648 = vmatprep.subr.bf16.mxu0 %v1756_v0 }
 0xa30   :  { %1649 = vmatpush3.bf16.msra.mxu0 %v1823_v23 }
 0xa31   :  { %1650 = vmatprep.subr.bf16.mxu0 %v1756_v0 }
 0xa34   :  { %1651 = vmatpush3.bf16.msra.mxu0 %v1827_v24  ;;  %v976_v24 = vrot.slane %v1917_v49, 6 }
 0xa35   :  { %1652 = vmatprep.subr.bf16.mxu0 %v1756_v0 }
 0xa38   :  { %1653 = vmatpush3.bf16.msra.mxu0 %v1831_v25 }
 0xadb   :  { %v967_v17 = vpop.f32.mrf.mxu0 }
 0xadc   :  { %v968_v19 = vadd.f32 %v967_v17, %v931_v15 }
 0xadd   :  { %v1616_v21 = vpop.f32.mrf.mxu0 }
 0xade   :  { %v973_v18 = vmax.f32 %v968_v19, 0.0 }
 0xadf   :  { %v970_v20 = vpop.f32.mrf.mxu0 }
 0xae0   :  { %v974_v22 = vmul.f32 %v973_v18, %v929_v14  ;;  %1019 = vrot.lane.b32.xlu0 %v973_v18, %s1754_s12 }
 0xae1   :  { %v1617_v26 = vpop.f32.mrf.mxu0 }
 0xae2   :  { %v975_v23 = vpack.c.bf16 %v974_v22, %v974_v22 }
 0xae4   :  { %1635 = vmatmul.mubr.bf16.vlgmr.msra.gmra.mxu1 %v975_v23 }
 0xae5   :  { %1659 = vmatpush3.bf16.msra.mxu1 %v1864_v29  ;;  %1674 = vmatprep.mubr.msk.bf16.mxu1 %vm1757_vm0, %v1756_v0 }
 0xae6   :  { %1660 = vmatprep.subr.bf16.mxu1 %v1756_v0 }
 0xae9   :  { %1661 = vmatpush3.bf16.msra.mxu1 %v1867_v30 }
 0xaea   :  { %1662 = vmatprep.subr.bf16.mxu1 %v1756_v0 }
 0xaed   :  { %1663 = vmatpush3.bf16.msra.mxu1 %v1871_v31 }
 0xaee   :  { %1664 = vmatprep.subr.bf16.mxu1 %v1756_v0 }
 0xaf1   :  { %1665 = vmatpush3.bf16.msra.mxu1 %v1875_v32 }
 0xaf2   :  { %1666 = vmatprep.subr.bf16.mxu1 %v1756_v0 }
 0xaf5   :  { %1667 = vmatpush3.bf16.msra.mxu1 %v1879_v33 }
 0xaf6   :  { %1668 = vmatprep.subr.bf16.mxu1 %v1756_v0 }
 0xaf9   :  { %1669 = vmatpush3.bf16.msra.mxu1 %v1883_v34 }
 0xafa   :  { %1670 = vmatprep.subr.bf16.mxu1 %v1756_v0 }
 0xafd   :  { %1671 = vmatpush3.bf16.msra.mxu1 %v1888_v35  ;;  %v1025_v35 = vrot.slane %v1896_v37, 7 }
 0xafe   :  { %1672 = vmatprep.subr.bf16.mxu1 %v1756_v0 }
 0xb01   :  { %1673 = vmatpush3.bf16.msra.mxu1 %v1892_v36 }
 0xb52   :  { %v1020_v28 = vpop.permute.xlu0 %1019 }
 0xba4   :  { %v1012_v25 = vpop.f32.mrf.mxu1 }
 0xba5   :  { %v1013_v29 = vadd.f32 %v1012_v25, %v976_v24 }
 0xba6   :  { %v1636_v30 = vpop.f32.mrf.mxu1 }
 0xba7   :  { %1727 = vtanh.f32 %v1013_v29 }
 0xba8   :  { %v1015_v31 = vpop.f32.mrf.mxu1 }
 0xbaa   :  { %v1637_v32 = vpop.f32.mrf.mxu1 }
 0xbb4   :  { %v1728_v33 = vpop.eup %1727 }
 0xbb5   :  { %v1021_v27 = vsub.f32 %v1728_v33, %v929_v14 }
 0xbb7   :  { %v1022_v34 = vmul.f32 %v1021_v27, %v1020_v28 }
 0xbb9   :  { %v1023_v38 = vadd.f32 %v1022_v34, %v929_v14 }
 0xbbb   :  { %v1024_v39 = vpack.c.bf16 %v1023_v38, %v1023_v38 }
 0xbbd   :  { %1655 = vmatmul.mubr.bf16.vlgmr.msra.gmra.mxu0 %v1024_v39 }
 0xc7d   :  { %v1061_v0 = vpop.f32.mrf.mxu0 }
 0xc7e   :  { %v1062_v40 = vadd.f32 %v1061_v0, %v1025_v35 }
 0xc7f   :  { %v1656_v36 = vpop.f32.mrf.mxu0 }
 0xc80   :  { %v1067_v41 = vmax.f32 %v1062_v40, 0.0 }
 0xc81   :  { %v1064_v42 = vpop.f32.mrf.mxu0 }
 0xc82   :  { %v1068_v43 = vmul.f32 %v1067_v41, %v1023_v38  ;;  %1113 = vrot.lane.b32.xlu1 %v1067_v41, %s1754_s12 }
 0xc83   :  { %v1657_v44 = vpop.f32.mrf.mxu0 }
 0xc84   :  { %v1069_v45 = vpack.c.bf16 %v1068_v43, %v1068_v43 }
 0xc86   :  { %1675 = vmatmul.mubr.bf16.vlgmr.msra.gmra.mxu1 %v1069_v45 }
 0xcf4   :  { %v1114_v54 = vpop.permute.xlu1 %1113 }
 0xd46   :  { %v1106_v47 = vpop.f32.mrf.mxu1 }
 0xd47   :  { %v1107_v48 = vadd.f32 %v1106_v47, %v1070_v46 }
 0xd48   :  { %v1676_v50 = vpop.f32.mrf.mxu1 }
 0xd49   :  { %1729 = vtanh.f32 %v1107_v48 }
 0xd4a   :  { %v1109_v51 = vpop.f32.mrf.mxu1 }
 0xd4c   :  { %v1677_v52 = vpop.f32.mrf.mxu1 }
 0xd56   :  { %v1730_v37 = vpop.eup %1729 }
 0xd57   :  { %v1115_v53 = vsub.f32 %v1730_v37, %v1023_v38 }
 0xd59   :  { %v1116_v55 = vmul.f32 %v1115_v53, %v1114_v54 }
 0xd5b   :  { %v1117_v56 = vadd.f32 %v1116_v55, %v1023_v38 }
 0xd5d   :  { %1118 = vst [vmem:[%s2164_s2] sm:$0x1] %v1117_v56 }
 0xd5e   :  { %1123 = vsyncpa [#allocation3], 1 }

</bundles_post_ra>
